<compile_context>
chip_gen: v7x
topology: tpu7x:2x2x1
jax: 0.10.0
libtpu: 0.0.40
codegen_flags: <defaults>
</compile_context>

<pallas_src>
import functools

import jax
import jax.numpy as jnp
from jax import lax
from jax.experimental import pallas as pl
from jax.experimental.pallas import tpu as pltpu


def _round_up(x, m):
    return -(-x // m) * m


def _pick_s_tile(s, target):
    """Largest S-tile <= target that divides S and keeps sublanes 8-aligned."""
    if s <= target:
        return s
    for t in range(target, 7, -1):
        if s % t == 0 and t % 8 == 0:
            return t
    return s


def _block_bytes(shape, itemsize=4):
    dims = [int(d) for d in shape if d is not None]
    if not dims:
        return itemsize
    dims[-1] = _round_up(dims[-1], 128)
    if len(dims) >= 2:
        dims[-2] = _round_up(dims[-2], 8)
    n = 1
    for d in dims:
        n *= d
    return n * itemsize


def _vmem_limit(block_shapes):
    """Scoped-VMEM request sized from padded block bytes (double buffering plus
    headroom for in-kernel temporaries), clamped so it is safe on v5e/v6e/v7x."""
    need = sum(_block_bytes(s) for s in block_shapes)
    return int(min(max(4 * need + (8 << 20), 32 << 20), 48 << 20))


# ---------------------------------------------------------------------------
# Pallas kernel 1: fused squared-distance (MXU) + k-NN selection
# ---------------------------------------------------------------------------
def _knn_kernel(q_ref, xyz_t_ref, idx_ref):
    # q_ref:     (TS, 3)  query centers (FPS points)
    # xyz_t_ref: (3, N)   all points, transposed -> N is lane-dense
    # idx_ref:   (TS, K)  int32 indices of the K nearest points
    q = q_ref[...]
    xt = xyz_t_ref[...]
    ts, n = q.shape[0], xt.shape[1]
    k_n = idx_ref.shape[1]

    # Distances on the MXU (same -2ab + a^2 + b^2 form as torch.square_distance);
    # only the two squared-norm corrections run on the VPU.
    cross = jnp.dot(q, xt, preferred_element_type=jnp.float32)       # (TS, N)
    qsq = jnp.sum(q * q, axis=1, keepdims=True)                      # (TS, 1)
    xsq = jnp.sum(xt * xt, axis=0, keepdims=True)                    # (1, N)
    d = qsq + xsq - 2.0 * cross

    # Iterative top-K (K small, unrolled).  Lane index carried as f32 (valid
    # for N < 2^24).  Tie-break = lowest lane index; torch.topk tie order is
    # implementation-defined, downstream values are identical.
    lane_f = lax.broadcasted_iota(jnp.int32, (ts, n), 1).astype(jnp.float32)
    col_id = lax.broadcasted_iota(jnp.int32, (ts, k_n), 1)
    acc = jnp.zeros((ts, k_n), jnp.int32)
    inf = jnp.float32(jnp.inf)
    # TODO(synk): fuse the two cross-lane reductions per step into one (argmin /
    # packed key) and use a chunked two-level selection (+ N tiling) for large N.
    for k in range(k_n):
        dmin = jnp.min(d, axis=1, keepdims=True)                     # (TS, 1)
        cand = jnp.where(d <= dmin, lane_f, jnp.float32(n))          # first-min lane
        sel = jnp.min(cand, axis=1, keepdims=True)                   # (TS, 1) f32
        acc = jnp.where(col_id == k, sel.astype(jnp.int32), acc)
        d = jnp.where(lane_f == sel, inf, d)                         # mask selected
    idx_ref[...] = acc


def knn_indices(nsample, xyz, new_xyz):
    """Indices of the `nsample` nearest points in `xyz` for each `new_xyz` row."""
    b, n, _ = xyz.shape
    s = new_xyz.shape[1]
    xyz_t = jnp.transpose(xyz, (0, 2, 1))        # (B, 3, N): lane-dense along N
    ts = _pick_s_tile(s, target=128)
    blocks = [(ts, 3), (3, n), (ts, n), (ts, n), (ts, nsample)]
    return pl.pallas_call(
        _knn_kernel,
        out_shape=jax.ShapeDtypeStruct((b, s, nsample), jnp.int32),
        grid=(b, s // ts),
        in_specs=[
            pl.BlockSpec((None, ts, 3), lambda i, j: (i, j, 0)),
            pl.BlockSpec((None, 3, n), lambda i, j: (i, 0, 0)),
        ],
        out_specs=pl.BlockSpec((None, ts, nsample), lambda i, j: (i, j, 0)),
        compiler_params=pltpu.CompilerParams(
            dimension_semantics=("parallel", "parallel"),
            vmem_limit_bytes=_vmem_limit(blocks)),
    )(new_xyz, xyz_t)


# ---------------------------------------------------------------------------
# Pallas kernel 2a: fused per-row sum / sum-of-squares of the centered features
# ---------------------------------------------------------------------------
def _stats_kernel(g_ref, anch_ref, out_ref, *, normalize):
    # g_ref: (TS, K, D); anch_ref: (TS, D); out_ref: (TS, 2) = [sum, sum_sq]
    g = g_ref[...]
    if normalize == "center":
        mean = jnp.mean(g, axis=1, keepdims=True)            # per-group mean over K
    else:  # "anchor"
        mean = anch_ref[...][:, None, :]
    c = g - mean
    s1 = jnp.sum(jnp.sum(c, axis=2), axis=1, keepdims=True)          # (TS, 1)
    s2 = jnp.sum(jnp.sum(c * c, axis=2), axis=1, keepdims=True)      # (TS, 1)
    out_ref[:, 0:1] = s1
    out_ref[:, 1:2] = s2


# ---------------------------------------------------------------------------
# Pallas kernel 2b: elementwise center + affine + anchor concat, single store
# ---------------------------------------------------------------------------
def _apply_kernel(g_ref, anch_ref, alpha_ref, beta_ref, out_ref, *,
                  normalize, c_feat):
    g = g_ref[...]                         # (TS, K, D)
    anch = anch_ref[...]                   # (TS, D)
    ts, k, d = g.shape

    if normalize is None:
        feats = g
    else:
        if normalize == "center":
            mean = jnp.mean(g, axis=1, keepdims=True)
        else:  # "anchor"
            mean = anch[:, None, :]
        # alpha_ref already carries alpha / (std + 1e-5) for this batch.
        feats = (alpha_ref[...][:, None, :] * (g - mean)
                 + beta_ref[...][:, None, :])

    anchor_b = jnp.broadcast_to(anch[:, None, :c_feat], (ts, k, c_feat))
    out = jnp.concatenate([feats, anchor_b], axis=-1)        # (TS, K, D + C)
    out_ref[...] = out.astype(out_ref.dtype)                 # one full-block store


def fused_group_normalize(grouped, anchor, alpha, beta, *, c_feat, normalize):
    b, s, k, d = grouped.shape
    d_out = d + c_feat
    ts = _pick_s_tile(s, target=64)
    grid = (b, s // ts)

    if normalize is not None:
        stats = pl.pallas_call(
            functools.partial(_stats_kernel, normalize=normalize),
            out_shape=jax.ShapeDtypeStruct((b, s, 2), jnp.float32),
            grid=grid,
            in_specs=[
                pl.BlockSpec((None, ts, k, d), lambda i, j: (i, j, 0, 0)),
                pl.BlockSpec((None, ts, d), lambda i, j: (i, j, 0)),
            ],
            out_specs=pl.BlockSpec((None, ts, 2), lambda i, j: (i, j, 0)),
            compiler_params=pltpu.CompilerParams(
                dimension_semantics=("parallel", "parallel"),
                vmem_limit_bytes=_vmem_limit([(ts, k, d), (ts, d), (ts, 2)])),
        )(grouped, anchor)
        # Tiny per-batch epilogue in XLA (B scalars): exact unbiased std,
        # exactly matching torch.std over the flattened centered tensor.
        s1 = jnp.sum(stats[:, :, 0], axis=1)                  # (B,)
        s2 = jnp.sum(stats[:, :, 1], axis=1)                  # (B,)
        n_el = float(s * k * d)
        mu = s1 / n_el
        var = jnp.maximum((s2 - n_el * mu * mu) / (n_el - 1.0), 0.0)
        inv = 1.0 / (jnp.sqrt(var) + 1e-5)                    # exact division
        alpha_eff = (jnp.asarray(alpha, jnp.float32).reshape(1, 1, d)
                     * inv[:, None, None])                    # (B, 1, D)
        beta_eff = jnp.asarray(beta, jnp.float32).reshape(1, 1, d)
    else:
        alpha_eff = jnp.ones((b, 1, d), jnp.float32)          # unused in this mode
        beta_eff = jnp.zeros((1, 1, d), jnp.float32)

    kernel = functools.partial(_apply_kernel, normalize=normalize, c_feat=c_feat)
    return pl.pallas_call(
        kernel,
        out_shape=jax.ShapeDtypeStruct((b, s, k, d_out), jnp.float32),
        grid=grid,
        in_specs=[
            pl.BlockSpec((None, ts, k, d), lambda i, j: (i, j, 0, 0)),
            pl.BlockSpec((None, ts, d), lambda i, j: (i, j, 0)),
            pl.BlockSpec((None, 1, d), lambda i, j: (i, 0, 0)),
            pl.BlockSpec((None, 1, d), lambda i, j: (0, 0, 0)),
        ],
        out_specs=pl.BlockSpec((None, ts, k, d_out), lambda i, j: (i, j, 0, 0)),
        compiler_params=pltpu.CompilerParams(
            dimension_semantics=("parallel", "parallel"),
            vmem_limit_bytes=_vmem_limit(
                [(ts, k, d), (ts, d), (1, d), (1, d), (ts, k, d_out)])),
    )(grouped, anchor, alpha_eff, beta_eff)


# ---------------------------------------------------------------------------
# Plain-JAX glue (sequential FPS, gather) — data-dependent, not the hot path
# ---------------------------------------------------------------------------
def farthest_point_sample(xyz, npoint, key):
    # TODO(synk): move into a Pallas kernel keeping xyz + the running distance
    # vector resident in VMEM across all S iterations (avoids per-step HBM reads).
    B, N, _ = xyz.shape
    farthest = jax.random.randint(key, (B,), 0, N, dtype=jnp.int32)
    distance = jnp.full((B, N), 1e10, dtype=jnp.float32)
    centroids = jnp.zeros((B, npoint), dtype=jnp.int32)

    def body(i, carry):
        centroids, distance, farthest = carry
        centroids = centroids.at[:, i].set(farthest)
        centroid = jax.vmap(lambda p, f: p[f])(xyz, farthest)[:, None, :]
        dist = jnp.sum((xyz - centroid) ** 2, axis=-1)
        distance = jnp.minimum(distance, dist)
        farthest = jnp.argmax(distance, axis=-1).astype(jnp.int32)
        return centroids, distance, farthest

    centroids, _, _ = lax.fori_loop(0, npoint, body, (centroids, distance, farthest))
    return centroids


def index_points(points, idx):
    # points: (B, N, D); idx: (B, S) or (B, S, K) -> gather along the point axis
    return jax.vmap(lambda p, i: p[i])(points, idx)


# ---------------------------------------------------------------------------
# LocalGrouper.forward
# ---------------------------------------------------------------------------
def local_grouper_forward(xyz, points, alpha, beta, groups, kneighbors, key,
                          use_xyz=True, normalize="center"):
    B, N, _ = xyz.shape
    C = points.shape[-1]
    S, K = groups, kneighbors
    if normalize is not None:
        normalize = normalize.lower()
        if normalize not in ("center", "anchor"):
            normalize = None

    # Lane-dense pre-concat: one (B, N, C+3) feature array so the grouped data
    # never materializes a (S, K, 3) padded slab and only one gather pass runs
    # over the big data.
    feats = jnp.concatenate([points, xyz], axis=-1) if use_xyz else points

    fps_idx = farthest_point_sample(xyz, S, key)              # (B, S)
    anchor = index_points(feats, fps_idx)                     # (B, S, C[+3])
    new_xyz = anchor[:, :, C:C + 3] if use_xyz else index_points(xyz, fps_idx)

    idx = knn_indices(K, xyz, new_xyz)                        # Pallas kernel 1
    # TODO(synk): fuse this gather into the norm kernels (scalar-prefetch idx in
    # SMEM + coalesced per-row DMAs from the HBM-resident feats) to cut the
    # grouped-data HBM traffic ~3x.
    grouped = index_points(feats, idx)                        # (B, S, K, C[+3])

    new_points_out = fused_group_normalize(                   # Pallas kernels 2a/2b
        grouped, anchor, alpha, beta, c_feat=C, normalize=normalize)
    return new_xyz, new_points_out


if __name__ == "__main__":
    key = jax.random.PRNGKey(0)
    k_xyz, k_pts, k_fps = jax.random.split(key, 3)

    B, N = 2, 32        # batch, number of points
    C = 4               # feature channels of `points`
    S, K = 8, 4         # groups (FPS centers), k-neighbors

    xyz = jax.random.normal(k_xyz, (B, N, 3), dtype=jnp.float32)
    points = jax.random.normal(k_pts, (B, N, C), dtype=jnp.float32)

    # Parameters exactly as the module's __init__: ones / zeros, shape [1,1,1,C+3]
    affine_alpha = jnp.ones((1, 1, 1, C + 3), dtype=jnp.float32)
    affine_beta = jnp.zeros((1, 1, 1, C + 3), dtype=jnp.float32)

    new_xyz, new_points = local_grouper_forward(
        xyz, points, affine_alpha, affine_beta, S, K, k_fps,
        use_xyz=True, normalize="center")

    jax.block_until_ready((new_xyz, new_points))
    assert new_xyz.shape == (B, S, 3)
    assert new_points.shape == (B, S, K, 2 * C + 3)
    assert bool(jnp.all(jnp.isfinite(new_points)))
    print("KERNEL_OK")
</pallas_src>

<mosaic_0001>
module attributes {stable_mosaic.version = 11 : i64} {
  func.func @_knn_kernel(%arg0: i32, %arg1: i32, %arg2: memref<1x8x3xf32, #tpu.memory_space<vmem>>, %arg3: memref<1x3x32xf32, #tpu.memory_space<vmem>>, %arg4: memref<1x8x4xi32, #tpu.memory_space<vmem>>) attributes {dimension_semantics = [#tpu.dimension_semantics<parallel>, #tpu.dimension_semantics<parallel>], iteration_bounds = array<i64: 2, 1>, scalar_prefetch = 0 : i64, scratch_operands = 0 : i64, tpu.core_type = #tpu.core_type<tc>, window_params = [{transform_indices = @transform_0, window_bounds = array<i64: 1, 8, 3>}, {transform_indices = @transform_1, window_bounds = array<i64: 1, 3, 32>}, {transform_indices = @transform_2, window_bounds = array<i64: 1, 8, 4>}]} {
    %c0 = arith.constant 0 : index
    %c0_0 = arith.constant 0 : index
    %c0_1 = arith.constant 0 : index
    %0 = vector.load %arg2[%c0, %c0_0, %c0_1] : memref<1x8x3xf32, #tpu.memory_space<vmem>>, vector<1x8x3xf32>
    %1 = vector.shape_cast %0 : vector<1x8x3xf32> to vector<8x3xf32>
    %c0_2 = arith.constant 0 : index
    %c0_3 = arith.constant 0 : index
    %c0_4 = arith.constant 0 : index
    %2 = vector.load %arg3[%c0_2, %c0_3, %c0_4] : memref<1x3x32xf32, #tpu.memory_space<vmem>>, vector<1x3x32xf32>
    %3 = vector.shape_cast %2 : vector<1x3x32xf32> to vector<3x32xf32>
    %cst = arith.constant dense<0.000000e+00> : vector<8x32xf32>
    %4 = tpu.matmul %1, %3, %cst {dimension_numbers = #tpu.dot_dimension_numbers<[1], [0], [0], [1], [0, 0, 1, 1], [], []>} : vector<8x3xf32>, vector<3x32xf32>, vector<8x32xf32> -> vector<8x32xf32>
    %5 = arith.mulf %1, %1 : vector<8x3xf32>
    %cst_5 = arith.constant dense<0.000000e+00> : vector<8xf32>
    %6 = vector.multi_reduction <add>, %5, %cst_5 [1] : vector<8x3xf32> to vector<8xf32>
    %7 = vector.shape_cast %6 : vector<8xf32> to vector<8x1xf32>
    %8 = arith.mulf %3, %3 : vector<3x32xf32>
    %cst_6 = arith.constant dense<0.000000e+00> : vector<32xf32>
    %9 = vector.multi_reduction <add>, %8, %cst_6 [0] : vector<3x32xf32> to vector<32xf32>
    %10 = vector.shape_cast %9 : vector<32xf32> to vector<1x32xf32>
    %11 = vector.broadcast %7 : vector<8x1xf32> to vector<8x32xf32>
    %12 = vector.broadcast %10 : vector<1x32xf32> to vector<8x32xf32>
    %13 = arith.addf %11, %12 : vector<8x32xf32>
    %cst_7 = arith.constant 2.000000e+00 : f32
    %14 = vector.broadcast %cst_7 : f32 to vector<8x32xf32>
    %15 = arith.mulf %14, %4 : vector<8x32xf32>
    %16 = arith.subf %13, %15 : vector<8x32xf32>
    %17 = tpu.iota {dimensions = array<i32: 1>} : vector<8x32xi32>
    %18 = arith.sitofp %17 : vector<8x32xi32> to vector<8x32xf32>
    %19 = tpu.iota {dimensions = array<i32: 1>} : vector<8x4xi32>
    %c0_i32 = arith.constant 0 : i32
    %20 = vector.broadcast %c0_i32 : i32 to vector<8x4xi32>
    %cst_8 = arith.constant dense<0x7F800000> : vector<8xf32>
    %21 = vector.multi_reduction <minimumf>, %16, %cst_8 [1] : vector<8x32xf32> to vector<8xf32>
    %22 = vector.shape_cast %21 : vector<8xf32> to vector<8x1xf32>
    %23 = vector.broadcast %22 : vector<8x1xf32> to vector<8x32xf32>
    %24 = arith.cmpf ole, %16, %23 : vector<8x32xf32>
    %cst_9 = arith.constant 3.200000e+01 : f32
    %25 = vector.broadcast %cst_9 : f32 to vector<8x32xf32>
    %26 = arith.select %24, %18, %25 : vector<8x32xi1>, vector<8x32xf32>
    %cst_10 = arith.constant dense<0x7F800000> : vector<8xf32>
    %27 = vector.multi_reduction <minimumf>, %26, %cst_10 [1] : vector<8x32xf32> to vector<8xf32>
    %28 = vector.shape_cast %27 : vector<8xf32> to vector<8x1xf32>
    %c0_i32_11 = arith.constant 0 : i32
    %29 = vector.broadcast %c0_i32_11 : i32 to vector<8x4xi32>
    %30 = arith.cmpi eq, %19, %29 : vector<8x4xi32>
    %31 = arith.fptosi %28 : vector<8x1xf32> to vector<8x1xi32>
    %32 = vector.shape_cast %31 : vector<8x1xi32> to vector<8x1xi32>
    %33 = vector.broadcast %32 : vector<8x1xi32> to vector<8x4xi32>
    %34 = arith.select %30, %33, %20 : vector<8x4xi1>, vector<8x4xi32>
    %35 = vector.broadcast %28 : vector<8x1xf32> to vector<8x32xf32>
    %36 = arith.cmpf oeq, %18, %35 : vector<8x32xf32>
    %cst_12 = arith.constant 0x7F800000 : f32
    %37 = vector.broadcast %cst_12 : f32 to vector<8x32xf32>
    %38 = arith.select %36, %37, %16 : vector<8x32xi1>, vector<8x32xf32>
    %cst_13 = arith.constant dense<0x7F800000> : vector<8xf32>
    %39 = vector.multi_reduction <minimumf>, %38, %cst_13 [1] : vector<8x32xf32> to vector<8xf32>
    %40 = vector.shape_cast %39 : vector<8xf32> to vector<8x1xf32>
    %41 = vector.broadcast %40 : vector<8x1xf32> to vector<8x32xf32>
    %42 = arith.cmpf ole, %38, %41 : vector<8x32xf32>
    %cst_14 = arith.constant 3.200000e+01 : f32
    %43 = vector.broadcast %cst_14 : f32 to vector<8x32xf32>
    %44 = arith.select %42, %18, %43 : vector<8x32xi1>, vector<8x32xf32>
    %cst_15 = arith.constant dense<0x7F800000> : vector<8xf32>
    %45 = vector.multi_reduction <minimumf>, %44, %cst_15 [1] : vector<8x32xf32> to vector<8xf32>
    %46 = vector.shape_cast %45 : vector<8xf32> to vector<8x1xf32>
    %c1_i32 = arith.constant 1 : i32
    %47 = vector.broadcast %c1_i32 : i32 to vector<8x4xi32>
    %48 = arith.cmpi eq, %19, %47 : vector<8x4xi32>
    %49 = arith.fptosi %46 : vector<8x1xf32> to vector<8x1xi32>
    %50 = vector.shape_cast %49 : vector<8x1xi32> to vector<8x1xi32>
    %51 = vector.broadcast %50 : vector<8x1xi32> to vector<8x4xi32>
    %52 = arith.select %48, %51, %34 : vector<8x4xi1>, vector<8x4xi32>
    %53 = vector.broadcast %46 : vector<8x1xf32> to vector<8x32xf32>
    %54 = arith.cmpf oeq, %18, %53 : vector<8x32xf32>
    %cst_16 = arith.constant 0x7F800000 : f32
    %55 = vector.broadcast %cst_16 : f32 to vector<8x32xf32>
    %56 = arith.select %54, %55, %38 : vector<8x32xi1>, vector<8x32xf32>
    %cst_17 = arith.constant dense<0x7F800000> : vector<8xf32>
    %57 = vector.multi_reduction <minimumf>, %56, %cst_17 [1] : vector<8x32xf32> to vector<8xf32>
    %58 = vector.shape_cast %57 : vector<8xf32> to vector<8x1xf32>
    %59 = vector.broadcast %58 : vector<8x1xf32> to vector<8x32xf32>
    %60 = arith.cmpf ole, %56, %59 : vector<8x32xf32>
    %cst_18 = arith.constant 3.200000e+01 : f32
    %61 = vector.broadcast %cst_18 : f32 to vector<8x32xf32>
    %62 = arith.select %60, %18, %61 : vector<8x32xi1>, vector<8x32xf32>
    %cst_19 = arith.constant dense<0x7F800000> : vector<8xf32>
    %63 = vector.multi_reduction <minimumf>, %62, %cst_19 [1] : vector<8x32xf32> to vector<8xf32>
    %64 = vector.shape_cast %63 : vector<8xf32> to vector<8x1xf32>
    %c2_i32 = arith.constant 2 : i32
    %65 = vector.broadcast %c2_i32 : i32 to vector<8x4xi32>
    %66 = arith.cmpi eq, %19, %65 : vector<8x4xi32>
    %67 = arith.fptosi %64 : vector<8x1xf32> to vector<8x1xi32>
    %68 = vector.shape_cast %67 : vector<8x1xi32> to vector<8x1xi32>
    %69 = vector.broadcast %68 : vector<8x1xi32> to vector<8x4xi32>
    %70 = arith.select %66, %69, %52 : vector<8x4xi1>, vector<8x4xi32>
    %71 = vector.broadcast %64 : vector<8x1xf32> to vector<8x32xf32>
    %72 = arith.cmpf oeq, %18, %71 : vector<8x32xf32>
    %cst_20 = arith.constant 0x7F800000 : f32
    %73 = vector.broadcast %cst_20 : f32 to vector<8x32xf32>
    %74 = arith.select %72, %73, %56 : vector<8x32xi1>, vector<8x32xf32>
    %cst_21 = arith.constant dense<0x7F800000> : vector<8xf32>
    %75 = vector.multi_reduction <minimumf>, %74, %cst_21 [1] : vector<8x32xf32> to vector<8xf32>
    %76 = vector.shape_cast %75 : vector<8xf32> to vector<8x1xf32>
    %77 = vector.broadcast %76 : vector<8x1xf32> to vector<8x32xf32>
    %78 = arith.cmpf ole, %74, %77 : vector<8x32xf32>
    %cst_22 = arith.constant 3.200000e+01 : f32
    %79 = vector.broadcast %cst_22 : f32 to vector<8x32xf32>
    %80 = arith.select %78, %18, %79 : vector<8x32xi1>, vector<8x32xf32>
    %cst_23 = arith.constant dense<0x7F800000> : vector<8xf32>
    %81 = vector.multi_reduction <minimumf>, %80, %cst_23 [1] : vector<8x32xf32> to vector<8xf32>
    %82 = vector.shape_cast %81 : vector<8xf32> to vector<8x1xf32>
    %c3_i32 = arith.constant 3 : i32
    %83 = vector.broadcast %c3_i32 : i32 to vector<8x4xi32>
    %84 = arith.cmpi eq, %19, %83 : vector<8x4xi32>
    %85 = arith.fptosi %82 : vector<8x1xf32> to vector<8x1xi32>
    %86 = vector.shape_cast %85 : vector<8x1xi32> to vector<8x1xi32>
    %87 = vector.broadcast %86 : vector<8x1xi32> to vector<8x4xi32>
    %88 = arith.select %84, %87, %70 : vector<8x4xi1>, vector<8x4xi32>
    %c0_24 = arith.constant 0 : index
    %c0_25 = arith.constant 0 : index
    %c0_26 = arith.constant 0 : index
    %89 = vector.load %arg4[%c0_24, %c0_25, %c0_26] : memref<1x8x4xi32, #tpu.memory_space<vmem>>, vector<1x8x4xi32>
    %90 = vector.shape_cast %89 : vector<1x8x4xi32> to vector<8x4xi32>
    %91 = vector.shape_cast %88 : vector<8x4xi32> to vector<1x8x4xi32>
    tpu.vector_store %arg4[%c0_24, %c0_25, %c0_26], %91 {strides = array<i32>} : memref<1x8x4xi32, #tpu.memory_space<vmem>>, vector<1x8x4xi32>,
    return
  }
  func.func @transform_0(%arg0: i32, %arg1: i32) -> (i32, i32, i32) {
    %c0_i32 = arith.constant 0 : i32
    %c0_i32_0 = arith.constant 0 : i32
    return %arg0, %arg1, %c0_i32 : i32, i32, i32
  }
  func.func @transform_1(%arg0: i32, %arg1: i32) -> (i32, i32, i32) {
    %c0_i32 = arith.constant 0 : i32
    %c0_i32_0 = arith.constant 0 : i32
    %c0_i32_1 = arith.constant 0 : i32
    return %arg0, %c0_i32, %c0_i32_0 : i32, i32, i32
  }
  func.func @transform_2(%arg0: i32, %arg1: i32) -> (i32, i32, i32) {
    %c0_i32 = arith.constant 0 : i32
    %c0_i32_0 = arith.constant 0 : i32
    return %arg0, %arg1, %c0_i32 : i32, i32, i32
  }
}

</mosaic_0001>

<bundles_post_ra>
// kernel: tpu_custom_call.1
= control target key start
LH: loop header
LB: loop body
LE: loop exit
PB: predicated region body
PF: predicated region fallthrough
CT: control target
= control target key end

     0   :  { %s519_s9 = smov 0   ;;  %s521_s10 = smov 0   ;;  %s571_s0 = inlined_call_operand.vmem [shape: f32[2,8,3], index: 0, kind: input, shape index: {}]   ;;  %s572_s1 = inlined_call_operand.vmem [shape: f32[2,3,32], index: 1, kind: input, shape index: {}]   ;;  %s573_s2 = inlined_call_operand.vmem [shape: s32[2,8,4], index: 2, kind: output, shape index: {}]  }
   0x1   :  { %s523_s11 = smov 0  }
   0x2 LB: > { %s24_s12 = sadd.s32 1, %s496_s10  ;;  %p429_p0 = scmp.ge.s32.totalorder %s500_s11, 1  ;;  %s500_s11 = sphi %s523_s11, %s12_s11   ;;  %s496_s10 = sphi %s521_s10, %s575_s10   ;;  %s492_s9 = sphi %s519_s9, %s574_s9  }
   0x3   : > { %p26_p1 = scmp.ge.s32.totalorder %s24_s12, 2  ;;  %p139_p2 = scmp.lt.s32.totalorder %s500_s11, 3 }
   0x5   : > { %s577_s12 = smov (%p26_p1, %s24_s12), 0  ;;  %p140_p3 = pnand %p429_p0, %p139_p2 }
   0x6   : > { %p169_p4 = scmp.lt.s32.totalorder (!%p140_p3), %s492_s9, 1  ;;  %v502_v0 = vmov (!%p140_p3), 0.0   ;;  %vm503_vm0 = vmmov (!%p140_p3), 0   ;;  %vm193_vm1 = vcmask (!%p140_p3), 1042432   ;;  %vm189_vm2 = vcmask (!%p140_p3), 23552  }
   0x7   : > { %143 = sbr.rel (%p140_p3) target bundleno = 1399 (0x577), region = 28  ;;  %439 = vmatprep.subr.mxu0 (!%p140_p3), %v502_v0  ;;  %441 = vmatprep.mubr.msk.f32.mxu0 (!%p140_p3), %vm503_vm0, %v502_v0  ;;  %vm272_vm3 = vcmask (!%p140_p3), 256000   ;;  %vm286_vm4 = vcmask (!%p140_p3), 261120   ;;  %v283_v20 = vlaneseq (!%p140_p3)  ;;  %vm337_vm0 = vcmask (!%p140_p3), 31744  }
   0x9   : > { %v284_v21 = vand.u32 (!%p140_p3), 127, %v283_v20 }
   0xb   : > { %v285_v22 = vcvt.s32.f32 (!%p140_p3), %v284_v21  ;;  %vm295_vm12 = vcmp.eq.s32.totalorder (!%p140_p3), %v284_v21, 0  ;;  %vm308_vm13 = vcmp.eq.s32.totalorder (!%p140_p3), %v284_v21, 1  ;;  %vm321_vm14 = vcmp.eq.s32.totalorder (!%p140_p3), %v284_v21, 2 }
   0xc   : > { %vm334_vm15 = vcmp.eq.s32.totalorder (!%p140_p3), %v284_v21, 3 }
   0xe   : > { %s579_s9 = smov (!%p169_p4, %s492_s9), 1 }
   0xf   : > { %s431_s13 = sshll.u32 %s579_s9, 2  ;;  %s430_s14 = sshll.u32 %s579_s9, 3 }
  0x10   : > { %s179_s17 = scalar_lea.vmem %s572_s1, %s431_s13  ;;  %s175_s20 = scalar_lea.vmem %s571_s0, %s430_s14 }
  0x11   : > { %v188_v1 = vld [vmem:[%s179_s17] sm:$0x7]  ;;  %s186_s23 = scalar_lea.vmem %s573_s2, %s430_s14 }
  0x12   : > { %v187_v2 = vld [vmem:[%s175_s20] sm:$0xff]  ;;  %440 = vmatpush3.msk.msra.mxu0 %vm193_vm1, %v188_v1  ;;  %v271_v5 = vmul.f32 %v188_v1, %v188_v1 }
  0x13   : > { %v267_v3 = vmul.f32 %v187_v2, %v187_v2  ;;  %442 = vmatmul.mubr.msk.f32.vlgmr.msra.gmra.mrb[0].mxu0 %vm189_vm2, %v187_v2 }
  0x14   : > { %v273_v6 = vsel %vm272_vm3, %v271_v5, 0.0 }
  0x15   : > { %v268_v4 = vsel %vm189_vm2, %v267_v3, 0.0  ;;  %v274_v7 = vrot.slane %v273_v6, 4 }
  0x16   : > { %269 = vadd.xlane.f32.xlu0 %v268_v4 }
  0x17   : > { %v275_v8 = vadd.f32 %v274_v7, %v273_v6 }
  0x19   : > { %v276_v9 = vrot.slane %v275_v8, 2 }
  0x1b   : > { %v277_v10 = vadd.f32 %v276_v9, %v275_v8 }
  0x1d   : > { %v278_v11 = vrot.slane %v277_v10, 1 }
  0x1f   : > { %v279_v12 = vadd.f32 %v278_v11, %v277_v10 }
  0xa3   : > { %v270_v13 = vpop.xlane.xlu0 %269 }
  0xa4   : > { %v280_v14 = vadd.f32 %v279_v12, %v270_v13 }
  0xe6   : > { %v263_v15 = vpop.f32.mrb[0].mxu0 }
  0xe7   : > { %v281_v16 = vmul.f32 2.0, %v263_v15  ;;  %v443_v17 = vpop.f32.mrb[1].mxu0 }
  0xe9   : > { %v282_v18 = vsub.f32 %v280_v14, %v281_v16 }
  0xeb   : > { %v287_v19 = vsel %vm286_vm4, %v282_v18, inf }
  0xec   : > { %288 = vmin.xlane.f32.xlu0 %v287_v19 }
 0x179   : > { %v289_v23 = vpop.xlane.xlu0 %288 }
 0x17a   : > { %vm290_vm5 = vcmp.le.f32.partialorder %v282_v18, %v289_v23 }
 0x17b   : > { %v291_v24 = vsel %vm290_vm5, %v285_v22, 32.0 }
 0x17c   : > { %v292_v25 = vsel %vm286_vm4, %v291_v24, inf }
 0x17d   : > { %293 = vmin.xlane.f32.xlu1 %v292_v25 }
 0x20a   : > { %v294_v26 = vpop.xlane.xlu1 %293 }
 0x20b   : > { %vm298_vm6 = vcmp.eq.f32.partialorder %v285_v22, %v294_v26  ;;  %v444_v44 = vtrunc.f32 %v294_v26 }
 0x20c   : > { %v299_v27 = vsel %vm298_vm6, inf, %v282_v18 }
 0x20d   : > { %v300_v28 = vsel %vm286_vm4, %v299_v27, inf  ;;  %v445_v47 = vcvt.f32.s32 %v444_v44 }
 0x20e   : > { %301 = vmin.xlane.f32.xlu1 %v300_v28 }
 0x20f   : > { %v297_v52 = vsel %vm295_vm12, %v445_v47, 0 }
 0x29b   : > { %v302_v29 = vpop.xlane.xlu1 %301 }
 0x29c   : > { %vm303_vm7 = vcmp.le.f32.partialorder %v299_v27, %v302_v29 }
 0x29d   : > { %v304_v30 = vsel %vm303_vm7, %v285_v22, 32.0 }
 0x29e   : > { %v305_v31 = vsel %vm286_vm4, %v304_v30, inf }
 0x29f   : > { %306 = vmin.xlane.f32.xlu0 %v305_v31 }
 0x32c   : > { %v307_v32 = vpop.xlane.xlu0 %306 }
 0x32d   : > { %vm311_vm8 = vcmp.eq.f32.partialorder %v285_v22, %v307_v32  ;;  %v446_v45 = vtrunc.f32 %v307_v32 }
 0x32e   : > { %v312_v33 = vsel %vm311_vm8, inf, %v299_v27 }
 0x32f   : > { %v313_v34 = vsel %vm286_vm4, %v312_v33, inf  ;;  %v447_v48 = vcvt.f32.s32 %v446_v45 }
 0x330   : > { %314 = vmin.xlane.f32.xlu1 %v313_v34 }
 0x331   : > { %v310_v53 = vsel %vm308_vm13, %v447_v48, %v297_v52 }
 0x3bd   : > { %v315_v35 = vpop.xlane.xlu1 %314 }
 0x3be   : > { %vm316_vm9 = vcmp.le.f32.partialorder %v312_v33, %v315_v35 }
 0x3bf   : > { %v317_v36 = vsel %vm316_vm9, %v285_v22, 32.0 }
 0x3c0   : > { %v318_v37 = vsel %vm286_vm4, %v317_v36, inf }
 0x3c1   : > { %319 = vmin.xlane.f32.xlu0 %v318_v37 }
 0x44e   : > { %v320_v38 = vpop.xlane.xlu0 %319 }
 0x44f   : > { %vm324_vm10 = vcmp.eq.f32.partialorder %v285_v22, %v320_v38  ;;  %v448_v46 = vtrunc.f32 %v320_v38 }
 0x450   : > { %v325_v39 = vsel %vm324_vm10, inf, %v312_v33 }
 0x451   : > { %v326_v40 = vsel %vm286_vm4, %v325_v39, inf  ;;  %v449_v49 = vcvt.f32.s32 %v448_v46 }
 0x452   : > { %327 = vmin.xlane.f32.xlu1 %v326_v40 }
 0x453   : > { %v323_v55 = vsel %vm321_vm14, %v449_v49, %v310_v53 }
 0x4df   : > { %v328_v41 = vpop.xlane.xlu1 %327 }
 0x4e0   : > { %vm329_vm11 = vcmp.le.f32.partialorder %v325_v39, %v328_v41 }
 0x4e1   : > { %v330_v42 = vsel %vm329_vm11, %v285_v22, 32.0 }
 0x4e2   : > { %v331_v43 = vsel %vm286_vm4, %v330_v42, inf }
 0x4e3   : > { %332 = vmin.xlane.f32.xlu0 %v331_v43 }
 0x570   : > { %v333_v50 = vpop.xlane.xlu0 %332 }
 0x571   : > { %v450_v51 = vtrunc.f32 %v333_v50 }
 0x573   : > { %v451_v54 = vcvt.f32.s32 %v450_v51 }
 0x575   : > { %v336_v56 = vsel %vm334_vm15, %v451_v54, %v323_v55 }
 0x576   : > { %338 = vst.msk [vmem:[%s186_s23] sm:$0xff] %vm337_vm0, %v336_v56 }
 0x577 PF: > { %s12_s11 = sadd.s32 1, %s500_s11   ;;  %s574_s9 = smov %s496_s10 }
 0x578   : > { %p9_p5 = scmp.ge.s32.totalorder %s12_s11, 4   ;;  %s575_s10 = smov %s577_s12 }
 0x57a   :  { %11 = sbr.rel (!%p9_p5) target bundleno = 2 (0x2), region = 61 }

</bundles_post_ra>
